<compile_context>
chip_gen: v7x
topology: tpu7x:2x2x1
jax: 0.10.0
libtpu: 0.0.40
codegen_flags: <defaults>
</compile_context>

<pallas_src>
import functools

import jax
import jax.numpy as jnp
from jax import lax
from jax.experimental import pallas as pl
from jax.experimental.pallas import tpu as pltpu


# ---------------------------------------------------------------------------
# no-upsample path: 1x1 conv only (lane-dense N*H*W lane axis, one grid step)
# ---------------------------------------------------------------------------
def _conv1x1_kernel(x_ref, w_ref, b_ref, o_ref, *, C):
    # x_ref: (C, N*H*W) VMEM   w_ref: (C,) SMEM   b_ref: (1,) SMEM
    # o_ref: (1, N*H*W) VMEM
    f32 = jnp.float32
    acc0 = x_ref[pl.ds(0, 1), :].astype(f32) * w_ref[0]
    acc1 = None
    for c in range(1, C):
        part = x_ref[pl.ds(c, 1), :].astype(f32) * w_ref[c]
        if c % 2:
            acc1 = part if acc1 is None else acc1 + part
        else:
            acc0 = acc0 + part
    y = acc0 if acc1 is None else acc0 + acc1
    o_ref[...] = (y + b_ref[0]).astype(o_ref.dtype)


def _conv1x1(x, conv_w, conv_b):
    """nn.Conv2d(C, 1, kernel_size=1, bias=True) on NCHW input."""
    N, C, H, W = x.shape
    NHW = N * H * W
    # channel-major relayout so the lane axis is N*H*W (lane-dense, one step).
    # TODO(synk): tile the lane axis for very large N*H*W (VMEM budget).
    xcm = x.transpose(1, 0, 2, 3).reshape(C, NHW)
    y = pl.pallas_call(
        functools.partial(_conv1x1_kernel, C=C),
        out_shape=jax.ShapeDtypeStruct((1, NHW), jnp.float32),
        grid_spec=pltpu.PrefetchScalarGridSpec(
            num_scalar_prefetch=0,
            grid=(1,),
            in_specs=[
                pl.BlockSpec((C, NHW), lambda i: (0, 0)),
                pl.BlockSpec(memory_space=pltpu.MemorySpace.SMEM),
                pl.BlockSpec(memory_space=pltpu.MemorySpace.SMEM),
            ],
            out_specs=pl.BlockSpec((1, NHW), lambda i: (0, 0)),
        ),
        compiler_params=pltpu.CompilerParams(dimension_semantics=("arbitrary",)),
        cost_estimate=pl.CostEstimate(
            flops=2 * N * C * H * W, transcendentals=0,
            bytes_accessed=(C * NHW) * x.dtype.itemsize + NHW * 4),
    )(xcm,
      conv_w.reshape(C).astype(jnp.float32),
      conv_b.reshape(1).astype(jnp.float32))
    return y.reshape(N, 1, H, W)


# ---------------------------------------------------------------------------
# fused path: 1x1 conv -> polyphase transposed conv -> crop, one kernel
# ---------------------------------------------------------------------------
def _fused_side_output_kernel(x_ref, w_ref, brow_ref, taps_ref, o_ref, ypad_ref,
                              *, C, H, Lb, Lscr, Hpad, pd, s, Ms, off_tot, Hq):
    # x_ref:    (C, H, Lb) VMEM     Nb images packed on lanes (stride Wst,
    #                               already zero padded per image by wrapper)
    # w_ref:    (C,)        SMEM    1x1-conv weights
    # brow_ref: (1, Lb)     VMEM    bias on valid columns, 0 on pad columns
    # taps_ref: (s*s*Ms*Ms,) SMEM   polyphase taps (flat)
    # o_ref:    (s*s, Hq, Lb) VMEM  cropped output, one lane-packed plane/phase
    # ypad_ref: (Hpad, Lscr) VMEM   scratch: zero-padded packed conv output
    f32 = jnp.float32

    # ---- refresh only the thin zero border (interior is written once below).
    if pd > 0:
        ypad_ref[pl.ds(0, pd), pl.ds(0, Lscr)] = jnp.zeros((pd, Lscr), f32)
    bot = Hpad - (pd + H)
    if bot > 0:
        ypad_ref[pl.ds(pd + H, bot), pl.ds(0, Lscr)] = jnp.zeros((bot, Lscr), f32)
    tail = Lscr - Lb
    if tail > 0:
        ypad_ref[pl.ds(pd, H), pl.ds(Lb, tail)] = jnp.zeros((H, tail), f32)

    # ---- lane-dense 1x1 conv on the VPU (two partial accumulators) ---------
    acc0 = x_ref[0].astype(f32) * w_ref[0]
    acc1 = None
    for c in range(1, C):
        part = x_ref[c].astype(f32) * w_ref[c]
        if c % 2:
            acc1 = part if acc1 is None else acc1 + part
        else:
            acc0 = acc0 + part
    y = acc0 if acc1 is None else acc0 + acc1
    # bias only on the true image columns (brow is 0 on per-image pad columns)
    ypad_ref[pl.ds(pd, H), pl.ds(0, Lb)] = y + brow_ref[...]

    # ---- polyphase correlation + crop: one lane-packed plane per phase -----
    # o[s*r+tr, n*Wst + s*c+tc valid part] built from
    #   sum_{m,n'} taps[ph_r,ph_c,m,n'] * ypad[r+qi0+m, col + qj0+n']
    taps = [taps_ref[i] for i in range(s * s * Ms * Ms)]
    for tr in range(s):
        ph_r, qi0 = (tr + off_tot) % s, (tr + off_tot) // s
        for tc in range(s):
            ph_c, qj0 = (tc + off_tot) % s, (tc + off_tot) // s
            accs = [None, None]
            idx = 0
            for m in range(Ms):
                for n in range(Ms):
                    t = taps[((ph_r * s + ph_c) * Ms + m) * Ms + n]
                    slab = ypad_ref[pl.ds(qi0 + m, Hq), pl.ds(qj0 + n, Lb)]
                    part = t * slab
                    accs[idx & 1] = part if accs[idx & 1] is None \
                        else accs[idx & 1] + part
                    idx += 1
            tot = accs[0] if accs[1] is None else accs[0] + accs[1]
            o_ref[tr * s + tc] = tot.astype(o_ref.dtype)


def _upsample_crop_fused(x, conv_w, conv_b, up_w, *, kernel_sz, stride,
                         upconv_pad, crop_offset, out_hw):
    N, C, H, W = x.shape
    K, s, p = kernel_sz, stride, upconv_pad
    full_h = (H - 1) * s + K - 2 * p           # output_padding = 0
    full_w = (W - 1) * s + K - 2 * p
    Hc, Wc = out_hw
    off = crop_offset

    # semantic-fidelity check: the crop window must lie inside the full
    # transposed-conv output (PyTorch index_select would fail otherwise).
    if off < 0 or off + Hc > full_h or off + Wc > full_w:
        raise ValueError(
            f"crop window (offset={off}, size=({Hc},{Wc})) does not fit the "
            f"transposed-conv output ({full_h},{full_w})")
    if K % s != 0:
        # TODO(synk): polyphase path assumes kernel_sz % stride == 0 (true for
        # the usual K=2s upsampling kernels); other configs need a fallback.
        raise NotImplementedError("kernel_sz must be a multiple of stride")
    if Hc % s or Wc % s:
        # TODO(synk): uneven per-phase row/col counts not implemented.
        raise NotImplementedError("output size must be a multiple of stride")

    Ms = K // s
    pd = Ms - 1
    Hq, Wq = Hc // s, Wc // s
    off_tot = off + p                          # crop offset + convT padding

    # distinct row/col base offsets read by the polyphase correlation
    offs = sorted({(t + off_tot) // s + m for t in range(s) for m in range(Ms)})
    max_off = offs[-1]
    Hpad = max(H + 2 * pd, max_off + Hq)       # padded rows in scratch
    Wst = max(W + 2 * pd, max_off + Wq)        # per-image padded lane stride

    # batch packing on the lane axis: Nb images per grid step, Nb | N,
    # targeting >= 128 lanes when the batch allows it.
    Nb = min(N, max(1, -(-128 // Wst)))
    while N % Nb:
        Nb -= 1
    G = N // Nb
    Lb = Nb * Wst                              # packed lane width per block
    Lscr = Lb + max_off                        # scratch lanes (room for shift)

    # direct trace-time slab-extent checks (review correctness concern)
    assert max_off + Hq <= Hpad and max_off + Wq <= Wst
    assert max_off + Lb <= Lscr

    # pack the batch into the lane axis with per-image zero padding
    # (wrapper-side layout plumbing; endorsed for lane-dense kernel slabs)
    x5 = x.reshape(G, Nb, C, H, W)
    x5 = jnp.pad(x5, ((0, 0), (0, 0), (0, 0), (0, 0), (pd, Wst - W - pd)))
    xp = x5.transpose(0, 2, 3, 1, 4).reshape(G, C, H, Lb)

    # bias row: conv bias on true columns, 0 on per-image pad columns
    col = jnp.arange(Lb, dtype=jnp.int32) % Wst
    bmask = (col >= pd) & (col < pd + W)
    brow = jnp.where(bmask, conv_b.reshape(()).astype(jnp.float32),
                     jnp.float32(0)).reshape(1, Lb)

    # polyphase tap table:
    # taps[ph_r, ph_c, m, n] = Wk[ph_r + (Ms-1-m)*s, ph_c + (Ms-1-n)*s]
    Wk = up_w.reshape(K, K).astype(jnp.float32)
    rows = jnp.arange(s)[:, None] + (Ms - 1 - jnp.arange(Ms))[None, :] * s
    taps = Wk[rows[:, None, :, None], rows[None, :, None, :]]   # (s,s,Ms,Ms)

    flops = 2 * N * C * H * W + 2 * N * Hc * Wc * Ms * Ms
    bytes_accessed = (N * C * H * W * x.dtype.itemsize
                      + G * s * s * Hq * Lb * 4
                      + (C + 1 + Lb + s * s * Ms * Ms) * 4)

    kern = functools.partial(_fused_side_output_kernel, C=C, H=H, Lb=Lb,
                             Lscr=Lscr, Hpad=Hpad, pd=pd, s=s, Ms=Ms,
                             off_tot=off_tot, Hq=Hq)
    phases = pl.pallas_call(
        kern,
        out_shape=jax.ShapeDtypeStruct((G, s * s, Hq, Lb), jnp.float32),
        grid_spec=pltpu.PrefetchScalarGridSpec(
            num_scalar_prefetch=0,
            grid=(G,),
            in_specs=[
                pl.BlockSpec((pl.Squeezed(), C, H, Lb), lambda g: (g, 0, 0, 0)),
                pl.BlockSpec(memory_space=pltpu.MemorySpace.SMEM),   # conv w
                pl.BlockSpec((1, Lb), lambda g: (0, 0)),             # bias row
                pl.BlockSpec(memory_space=pltpu.MemorySpace.SMEM),   # taps
            ],
            out_specs=pl.BlockSpec((pl.Squeezed(), s * s, Hq, Lb),
                                   lambda g: (g, 0, 0, 0)),
            scratch_shapes=[pltpu.VMEM((Hpad, Lscr), jnp.float32)],
        ),
        compiler_params=pltpu.CompilerParams(dimension_semantics=("parallel",)),
        cost_estimate=pl.CostEstimate(flops=flops, transcendentals=0,
                                      bytes_accessed=bytes_accessed),
    )(xp,
      conv_w.reshape(C).astype(jnp.float32),
      brow,
      taps.reshape(-1))

    # phase interleave + per-image valid-column extraction (tiny final output):
    # out[g*Nb+n, 0, s*r+tr, s*c+tc] = phases[g, tr*s+tc, r, n*Wst + c]
    ph6 = phases.reshape(G, s, s, Hq, Nb, Wst)[..., :Wq]
    out = ph6.transpose(0, 4, 3, 1, 5, 2).reshape(N, 1, Hc, Wc)
    return out


# ---------------------------------------------------------------------------
# full module forward
# ---------------------------------------------------------------------------
@functools.partial(jax.jit, static_argnames=("kernel_sz", "stride",
                                              "upconv_pad", "do_crops",
                                              "out_hw"))
def side_output_crop(res, conv_w, conv_b, up_w=None, *, kernel_sz=None,
                     stride=None, upconv_pad=0, do_crops=True, out_hw=None):
    """Forward pass of SideOutputCrop (NCHW, PyTorch semantics).

    `out_hw` is the static (H, W) of the crop reference ("data in") when
    do_crops=True; the reference tensor itself is never needed.
    """
    if kernel_sz is None:                       # upsample == False path
        return _conv1x1(res, conv_w, conv_b)
    N, _, H, W = res.shape
    K, s, p = kernel_sz, stride, upconv_pad
    full_h = (H - 1) * s + K - 2 * p
    full_w = (W - 1) * s + K - 2 * p
    if do_crops:
        if out_hw is None:
            raise ValueError("out_hw (reference spatial size) required when "
                             "do_crops=True")
        crop_offset = K // 4
    else:                                       # MyIdentity path (no crop)
        crop_offset = 0
        out_hw = (full_h, full_w)
    return _upsample_crop_fused(res, conv_w, conv_b, up_w,
                                kernel_sz=K, stride=s, upconv_pad=p,
                                crop_offset=crop_offset, out_hw=out_hw)


if __name__ == "__main__":
    N, C, H, W = 2, 4, 16, 16
    kernel_sz, stride, upconv_pad = 4, 2, 0

    key = jax.random.PRNGKey(0)
    k1, k2, k3, k4, k5 = jax.random.split(key, 5)
    x = jax.random.normal(k1, (N, C, H, W), jnp.float32)
    reference = jax.random.normal(k2, (N, 3, 32, 32), jnp.float32)   # "data in"
    conv_w = jax.random.normal(k3, (1, C, 1, 1), jnp.float32) * 0.5
    conv_b = jax.random.normal(k4, (1,), jnp.float32)
    up_w = jax.random.normal(k5, (1, 1, kernel_sz, kernel_sz), jnp.float32) * 0.25

    out = side_output_crop(x, conv_w, conv_b, up_w,
                           kernel_sz=kernel_sz, stride=stride,
                           upconv_pad=upconv_pad, do_crops=True,
                           out_hw=(reference.shape[2], reference.shape[3]))
    out = jax.block_until_ready(out)

    # pure-JAX reference for the same forward pass
    y_ref = jnp.einsum('nchw,oc->nohw', x, conv_w[:, :, 0, 0]) + \
        conv_b[None, :, None, None]
    kflip = up_w[:, :, ::-1, ::-1]
    p = kernel_sz - 1 - upconv_pad
    full = lax.conv_general_dilated(
        y_ref, kflip, window_strides=(1, 1), padding=[(p, p), (p, p)],
        lhs_dilation=(stride, stride),
        dimension_numbers=('NCHW', 'OIHW', 'NCHW'))
    off = kernel_sz // 4
    ref_out = full[:, :, off:off + reference.shape[2],
                   off:off + reference.shape[3]]

    assert out.shape == ref_out.shape, (out.shape, ref_out.shape)
    assert jnp.allclose(out, ref_out, atol=1e-4, rtol=1e-4)

    # also exercise the upsample == False path (conv-only)
    out2 = jax.block_until_ready(side_output_crop(x, conv_w, conv_b))
    assert out2.shape == y_ref.shape
    assert jnp.allclose(out2, y_ref, atol=1e-4, rtol=1e-4)

    print("KERNEL_OK")
</pallas_src>

<mosaic_0001>
module attributes {stable_mosaic.version = 11 : i64} {
  func.func @_fused_side_output_kernel(%arg0: i32, %arg1: memref<1x4x16x36xf32, #tpu.memory_space<vmem>>, %arg2: memref<4xf32, #tpu.memory_space<smem>>, %arg3: memref<1x36xf32, #tpu.memory_space<vmem>>, %arg4: memref<16xf32, #tpu.memory_space<smem>>, %arg5: memref<1x4x16x36xf32, #tpu.memory_space<vmem>>, %arg6: memref<18x38xf32, #tpu.memory_space<vmem>>) attributes {dimension_semantics = [#tpu.dimension_semantics<parallel>], iteration_bounds = array<i64: 1>, scalar_prefetch = 0 : i64, scratch_operands = 1 : i64, tpu.core_type = #tpu.core_type<tc>, window_params = [{transform_indices = @transform_0, window_bounds = array<i64: 1, 4, 16, 36>}, {transform_indices = @transform_1, window_bounds = array<i64: 4>}, {pipeline_mode = #tpu.pipeline_mode<synchronous>, transform_indices = @transform_2, window_bounds = array<i64: 1, 36>}, {transform_indices = @transform_3, window_bounds = array<i64: 16>}, {transform_indices = @transform_4, window_bounds = array<i64: 1, 4, 16, 36>}]} {
    %cst = arith.constant 0.000000e+00 : f32
    %0 = vector.broadcast %cst : f32 to vector<1x38xf32>
    %c0 = arith.constant 0 : index
    %c0_0 = arith.constant 0 : index
    %1 = vector.load %arg6[%c0, %c0_0] : memref<18x38xf32, #tpu.memory_space<vmem>>, vector<1x38xf32>
    tpu.vector_store %arg6[%c0, %c0_0], %0 {strides = array<i32>} : memref<18x38xf32, #tpu.memory_space<vmem>>, vector<1x38xf32>,
    %cst_1 = arith.constant 0.000000e+00 : f32
    %2 = vector.broadcast %cst_1 : f32 to vector<1x38xf32>
    %c17 = arith.constant 17 : index
    %c0_2 = arith.constant 0 : index
    %3 = vector.load %arg6[%c17, %c0_2] : memref<18x38xf32, #tpu.memory_space<vmem>>, vector<1x38xf32>
    tpu.vector_store %arg6[%c17, %c0_2], %2 {strides = array<i32>} : memref<18x38xf32, #tpu.memory_space<vmem>>, vector<1x38xf32>,
    %cst_3 = arith.constant 0.000000e+00 : f32
    %4 = vector.broadcast %cst_3 : f32 to vector<16x2xf32>
    %c1 = arith.constant 1 : index
    %c36 = arith.constant 36 : index
    %5 = vector.load %arg6[%c1, %c36] : memref<18x38xf32, #tpu.memory_space<vmem>>, vector<16x2xf32>
    tpu.vector_store %arg6[%c1, %c36], %4 {strides = array<i32>} : memref<18x38xf32, #tpu.memory_space<vmem>>, vector<16x2xf32>,
    %c0_4 = arith.constant 0 : index
    %c0_5 = arith.constant 0 : index
    %c0_6 = arith.constant 0 : index
    %c0_7 = arith.constant 0 : index
    %6 = vector.load %arg1[%c0_4, %c0_5, %c0_6, %c0_7] : memref<1x4x16x36xf32, #tpu.memory_space<vmem>>, vector<1x1x16x36xf32>
    %7 = vector.shape_cast %6 : vector<1x1x16x36xf32> to vector<16x36xf32>
    %c0_8 = arith.constant 0 : index
    %8 = memref.load %arg2[%c0_8] : memref<4xf32, #tpu.memory_space<smem>>
    %9 = vector.broadcast %8 : f32 to vector<16x36xf32>
    %10 = arith.mulf %7, %9 : vector<16x36xf32>
    %c0_9 = arith.constant 0 : index
    %c1_10 = arith.constant 1 : index
    %c0_11 = arith.constant 0 : index
    %c0_12 = arith.constant 0 : index
    %11 = vector.load %arg1[%c0_9, %c1_10, %c0_11, %c0_12] : memref<1x4x16x36xf32, #tpu.memory_space<vmem>>, vector<1x1x16x36xf32>
    %12 = vector.shape_cast %11 : vector<1x1x16x36xf32> to vector<16x36xf32>
    %c1_13 = arith.constant 1 : index
    %13 = memref.load %arg2[%c1_13] : memref<4xf32, #tpu.memory_space<smem>>
    %14 = vector.broadcast %13 : f32 to vector<16x36xf32>
    %15 = arith.mulf %12, %14 : vector<16x36xf32>
    %c0_14 = arith.constant 0 : index
    %c2 = arith.constant 2 : index
    %c0_15 = arith.constant 0 : index
    %c0_16 = arith.constant 0 : index
    %16 = vector.load %arg1[%c0_14, %c2, %c0_15, %c0_16] : memref<1x4x16x36xf32, #tpu.memory_space<vmem>>, vector<1x1x16x36xf32>
    %17 = vector.shape_cast %16 : vector<1x1x16x36xf32> to vector<16x36xf32>
    %c2_17 = arith.constant 2 : index
    %18 = memref.load %arg2[%c2_17] : memref<4xf32, #tpu.memory_space<smem>>
    %19 = vector.broadcast %18 : f32 to vector<16x36xf32>
    %20 = arith.mulf %17, %19 : vector<16x36xf32>
    %21 = arith.addf %10, %20 : vector<16x36xf32>
    %c0_18 = arith.constant 0 : index
    %c3 = arith.constant 3 : index
    %c0_19 = arith.constant 0 : index
    %c0_20 = arith.constant 0 : index
    %22 = vector.load %arg1[%c0_18, %c3, %c0_19, %c0_20] : memref<1x4x16x36xf32, #tpu.memory_space<vmem>>, vector<1x1x16x36xf32>
    %23 = vector.shape_cast %22 : vector<1x1x16x36xf32> to vector<16x36xf32>
    %c3_21 = arith.constant 3 : index
    %24 = memref.load %arg2[%c3_21] : memref<4xf32, #tpu.memory_space<smem>>
    %25 = vector.broadcast %24 : f32 to vector<16x36xf32>
    %26 = arith.mulf %23, %25 : vector<16x36xf32>
    %27 = arith.addf %15, %26 : vector<16x36xf32>
    %28 = arith.addf %21, %27 : vector<16x36xf32>
    %c0_22 = arith.constant 0 : index
    %c0_23 = arith.constant 0 : index
    %29 = vector.load %arg3[%c0_22, %c0_23] : memref<1x36xf32, #tpu.memory_space<vmem>>, vector<1x36xf32>
    %30 = vector.broadcast %29 : vector<1x36xf32> to vector<16x36xf32>
    %31 = arith.addf %28, %30 : vector<16x36xf32>
    %c1_24 = arith.constant 1 : index
    %c0_25 = arith.constant 0 : index
    %32 = vector.load %arg6[%c1_24, %c0_25] : memref<18x38xf32, #tpu.memory_space<vmem>>, vector<16x36xf32>
    tpu.vector_store %arg6[%c1_24, %c0_25], %31 {strides = array<i32>} : memref<18x38xf32, #tpu.memory_space<vmem>>, vector<16x36xf32>,
    %c0_26 = arith.constant 0 : index
    %33 = memref.load %arg4[%c0_26] : memref<16xf32, #tpu.memory_space<smem>>
    %c1_27 = arith.constant 1 : index
    %34 = memref.load %arg4[%c1_27] : memref<16xf32, #tpu.memory_space<smem>>
    %c2_28 = arith.constant 2 : index
    %35 = memref.load %arg4[%c2_28] : memref<16xf32, #tpu.memory_space<smem>>
    %c3_29 = arith.constant 3 : index
    %36 = memref.load %arg4[%c3_29] : memref<16xf32, #tpu.memory_space<smem>>
    %c4 = arith.constant 4 : index
    %37 = memref.load %arg4[%c4] : memref<16xf32, #tpu.memory_space<smem>>
    %c5 = arith.constant 5 : index
    %38 = memref.load %arg4[%c5] : memref<16xf32, #tpu.memory_space<smem>>
    %c6 = arith.constant 6 : index
    %39 = memref.load %arg4[%c6] : memref<16xf32, #tpu.memory_space<smem>>
    %c7 = arith.constant 7 : index
    %40 = memref.load %arg4[%c7] : memref<16xf32, #tpu.memory_space<smem>>
    %c8 = arith.constant 8 : index
    %41 = memref.load %arg4[%c8] : memref<16xf32, #tpu.memory_space<smem>>
    %c9 = arith.constant 9 : index
    %42 = memref.load %arg4[%c9] : memref<16xf32, #tpu.memory_space<smem>>
    %c10 = arith.constant 10 : index
    %43 = memref.load %arg4[%c10] : memref<16xf32, #tpu.memory_space<smem>>
    %c11 = arith.constant 11 : index
    %44 = memref.load %arg4[%c11] : memref<16xf32, #tpu.memory_space<smem>>
    %c12 = arith.constant 12 : index
    %45 = memref.load %arg4[%c12] : memref<16xf32, #tpu.memory_space<smem>>
    %c13 = arith.constant 13 : index
    %46 = memref.load %arg4[%c13] : memref<16xf32, #tpu.memory_space<smem>>
    %c14 = arith.constant 14 : index
    %47 = memref.load %arg4[%c14] : memref<16xf32, #tpu.memory_space<smem>>
    %c15 = arith.constant 15 : index
    %48 = memref.load %arg4[%c15] : memref<16xf32, #tpu.memory_space<smem>>
    %c0_30 = arith.constant 0 : index
    %c0_31 = arith.constant 0 : index
    %49 = vector.load %arg6[%c0_30, %c0_31] : memref<18x38xf32, #tpu.memory_space<vmem>>, vector<16x36xf32>
    %50 = vector.broadcast %45 : f32 to vector<16x36xf32>
    %51 = arith.mulf %50, %49 : vector<16x36xf32>
    %c0_32 = arith.constant 0 : index
    %c1_33 = arith.constant 1 : index
    %52 = vector.load %arg6[%c0_32, %c1_33] : memref<18x38xf32, #tpu.memory_space<vmem>>, vector<16x36xf32>
    %53 = vector.broadcast %46 : f32 to vector<16x36xf32>
    %54 = arith.mulf %53, %52 : vector<16x36xf32>
    %c1_34 = arith.constant 1 : index
    %c0_35 = arith.constant 0 : index
    %55 = vector.load %arg6[%c1_34, %c0_35] : memref<18x38xf32, #tpu.memory_space<vmem>>, vector<16x36xf32>
    %56 = vector.broadcast %47 : f32 to vector<16x36xf32>
    %57 = arith.mulf %56, %55 : vector<16x36xf32>
    %58 = arith.addf %51, %57 : vector<16x36xf32>
    %c1_36 = arith.constant 1 : index
    %c1_37 = arith.constant 1 : index
    %59 = vector.load %arg6[%c1_36, %c1_37] : memref<18x38xf32, #tpu.memory_space<vmem>>, vector<16x36xf32>
    %60 = vector.broadcast %48 : f32 to vector<16x36xf32>
    %61 = arith.mulf %60, %59 : vector<16x36xf32>
    %62 = arith.addf %54, %61 : vector<16x36xf32>
    %63 = arith.addf %58, %62 : vector<16x36xf32>
    %c0_38 = arith.constant 0 : index
    %c0_39 = arith.constant 0 : index
    %c0_40 = arith.constant 0 : index
    %c0_41 = arith.constant 0 : index
    %64 = vector.load %arg5[%c0_38, %c0_39, %c0_40, %c0_41] : memref<1x4x16x36xf32, #tpu.memory_space<vmem>>, vector<1x1x16x36xf32>
    %65 = vector.shape_cast %64 : vector<1x1x16x36xf32> to vector<16x36xf32>
    %66 = vector.shape_cast %63 : vector<16x36xf32> to vector<1x1x16x36xf32>
    tpu.vector_store %arg5[%c0_38, %c0_39, %c0_40, %c0_41], %66 {strides = array<i32>} : memref<1x4x16x36xf32, #tpu.memory_space<vmem>>, vector<1x1x16x36xf32>,
    %c0_42 = arith.constant 0 : index
    %c1_43 = arith.constant 1 : index
    %67 = vector.load %arg6[%c0_42, %c1_43] : memref<18x38xf32, #tpu.memory_space<vmem>>, vector<16x36xf32>
    %68 = vector.broadcast %41 : f32 to vector<16x36xf32>
    %69 = arith.mulf %68, %67 : vector<16x36xf32>
    %c0_44 = arith.constant 0 : index
    %c2_45 = arith.constant 2 : index
    %70 = vector.load %arg6[%c0_44, %c2_45] : memref<18x38xf32, #tpu.memory_space<vmem>>, vector<16x36xf32>
    %71 = vector.broadcast %42 : f32 to vector<16x36xf32>
    %72 = arith.mulf %71, %70 : vector<16x36xf32>
    %c1_46 = arith.constant 1 : index
    %c1_47 = arith.constant 1 : index
    %73 = vector.load %arg6[%c1_46, %c1_47] : memref<18x38xf32, #tpu.memory_space<vmem>>, vector<16x36xf32>
    %74 = vector.broadcast %43 : f32 to vector<16x36xf32>
    %75 = arith.mulf %74, %73 : vector<16x36xf32>
    %76 = arith.addf %69, %75 : vector<16x36xf32>
    %c1_48 = arith.constant 1 : index
    %c2_49 = arith.constant 2 : index
    %77 = vector.load %arg6[%c1_48, %c2_49] : memref<18x38xf32, #tpu.memory_space<vmem>>, vector<16x36xf32>
    %78 = vector.broadcast %44 : f32 to vector<16x36xf32>
    %79 = arith.mulf %78, %77 : vector<16x36xf32>
    %80 = arith.addf %72, %79 : vector<16x36xf32>
    %81 = arith.addf %76, %80 : vector<16x36xf32>
    %c0_50 = arith.constant 0 : index
    %c1_51 = arith.constant 1 : index
    %c0_52 = arith.constant 0 : index
    %c0_53 = arith.constant 0 : index
    %82 = vector.load %arg5[%c0_50, %c1_51, %c0_52, %c0_53] : memref<1x4x16x36xf32, #tpu.memory_space<vmem>>, vector<1x1x16x36xf32>
    %83 = vector.shape_cast %82 : vector<1x1x16x36xf32> to vector<16x36xf32>
    %84 = vector.shape_cast %81 : vector<16x36xf32> to vector<1x1x16x36xf32>
    tpu.vector_store %arg5[%c0_50, %c1_51, %c0_52, %c0_53], %84 {strides = array<i32>} : memref<1x4x16x36xf32, #tpu.memory_space<vmem>>, vector<1x1x16x36xf32>,
    %c1_54 = arith.constant 1 : index
    %c0_55 = arith.constant 0 : index
    %85 = vector.load %arg6[%c1_54, %c0_55] : memref<18x38xf32, #tpu.memory_space<vmem>>, vector<16x36xf32>
    %86 = vector.broadcast %37 : f32 to vector<16x36xf32>
    %87 = arith.mulf %86, %85 : vector<16x36xf32>
    %c1_56 = arith.constant 1 : index
    %c1_57 = arith.constant 1 : index
    %88 = vector.load %arg6[%c1_56, %c1_57] : memref<18x38xf32, #tpu.memory_space<vmem>>, vector<16x36xf32>
    %89 = vector.broadcast %38 : f32 to vector<16x36xf32>
    %90 = arith.mulf %89, %88 : vector<16x36xf32>
    %c2_58 = arith.constant 2 : index
    %c0_59 = arith.constant 0 : index
    %91 = vector.load %arg6[%c2_58, %c0_59] : memref<18x38xf32, #tpu.memory_space<vmem>>, vector<16x36xf32>
    %92 = vector.broadcast %39 : f32 to vector<16x36xf32>
    %93 = arith.mulf %92, %91 : vector<16x36xf32>
    %94 = arith.addf %87, %93 : vector<16x36xf32>
    %c2_60 = arith.constant 2 : index
    %c1_61 = arith.constant 1 : index
    %95 = vector.load %arg6[%c2_60, %c1_61] : memref<18x38xf32, #tpu.memory_space<vmem>>, vector<16x36xf32>
    %96 = vector.broadcast %40 : f32 to vector<16x36xf32>
    %97 = arith.mulf %96, %95 : vector<16x36xf32>
    %98 = arith.addf %90, %97 : vector<16x36xf32>
    %99 = arith.addf %94, %98 : vector<16x36xf32>
    %c0_62 = arith.constant 0 : index
    %c2_63 = arith.constant 2 : index
    %c0_64 = arith.constant 0 : index
    %c0_65 = arith.constant 0 : index
    %100 = vector.load %arg5[%c0_62, %c2_63, %c0_64, %c0_65] : memref<1x4x16x36xf32, #tpu.memory_space<vmem>>, vector<1x1x16x36xf32>
    %101 = vector.shape_cast %100 : vector<1x1x16x36xf32> to vector<16x36xf32>
    %102 = vector.shape_cast %99 : vector<16x36xf32> to vector<1x1x16x36xf32>
    tpu.vector_store %arg5[%c0_62, %c2_63, %c0_64, %c0_65], %102 {strides = array<i32>} : memref<1x4x16x36xf32, #tpu.memory_space<vmem>>, vector<1x1x16x36xf32>,
    %c1_66 = arith.constant 1 : index
    %c1_67 = arith.constant 1 : index
    %103 = vector.load %arg6[%c1_66, %c1_67] : memref<18x38xf32, #tpu.memory_space<vmem>>, vector<16x36xf32>
    %104 = vector.broadcast %33 : f32 to vector<16x36xf32>
    %105 = arith.mulf %104, %103 : vector<16x36xf32>
    %c1_68 = arith.constant 1 : index
    %c2_69 = arith.constant 2 : index
    %106 = vector.load %arg6[%c1_68, %c2_69] : memref<18x38xf32, #tpu.memory_space<vmem>>, vector<16x36xf32>
    %107 = vector.broadcast %34 : f32 to vector<16x36xf32>
    %108 = arith.mulf %107, %106 : vector<16x36xf32>
    %c2_70 = arith.constant 2 : index
    %c1_71 = arith.constant 1 : index
    %109 = vector.load %arg6[%c2_70, %c1_71] : memref<18x38xf32, #tpu.memory_space<vmem>>, vector<16x36xf32>
    %110 = vector.broadcast %35 : f32 to vector<16x36xf32>
    %111 = arith.mulf %110, %109 : vector<16x36xf32>
    %112 = arith.addf %105, %111 : vector<16x36xf32>
    %c2_72 = arith.constant 2 : index
    %c2_73 = arith.constant 2 : index
    %113 = vector.load %arg6[%c2_72, %c2_73] : memref<18x38xf32, #tpu.memory_space<vmem>>, vector<16x36xf32>
    %114 = vector.broadcast %36 : f32 to vector<16x36xf32>
    %115 = arith.mulf %114, %113 : vector<16x36xf32>
    %116 = arith.addf %108, %115 : vector<16x36xf32>
    %117 = arith.addf %112, %116 : vector<16x36xf32>
    %c0_74 = arith.constant 0 : index
    %c3_75 = arith.constant 3 : index
    %c0_76 = arith.constant 0 : index
    %c0_77 = arith.constant 0 : index
    %118 = vector.load %arg5[%c0_74, %c3_75, %c0_76, %c0_77] : memref<1x4x16x36xf32, #tpu.memory_space<vmem>>, vector<1x1x16x36xf32>
    %119 = vector.shape_cast %118 : vector<1x1x16x36xf32> to vector<16x36xf32>
    %120 = vector.shape_cast %117 : vector<16x36xf32> to vector<1x1x16x36xf32>
    tpu.vector_store %arg5[%c0_74, %c3_75, %c0_76, %c0_77], %120 {strides = array<i32>} : memref<1x4x16x36xf32, #tpu.memory_space<vmem>>, vector<1x1x16x36xf32>,
    return
  }
  func.func @transform_0(%arg0: i32) -> (i32, i32, i32, i32) {
    %c0_i32 = arith.constant 0 : i32
    %c0_i32_0 = arith.constant 0 : i32
    %c0_i32_1 = arith.constant 0 : i32
    %c0_i32_2 = arith.constant 0 : i32
    return %arg0, %c0_i32, %c0_i32_0, %c0_i32_1 : i32, i32, i32, i32
  }
  func.func @transform_1(%arg0: i32) -> i32 {
    %c0_i32 = arith.constant 0 : i32
    %c0_i32_0 = arith.constant 0 : i32
    return %c0_i32 : i32
  }
  func.func @transform_2(%arg0: i32) -> (i32, i32) {
    %c0_i32 = arith.constant 0 : i32
    %c0_i32_0 = arith.constant 0 : i32
    %c0_i32_1 = arith.constant 0 : i32
    return %c0_i32, %c0_i32_0 : i32, i32
  }
  func.func @transform_3(%arg0: i32) -> i32 {
    %c0_i32 = arith.constant 0 : i32
    %c0_i32_0 = arith.constant 0 : i32
    return %c0_i32 : i32
  }
  func.func @transform_4(%arg0: i32) -> (i32, i32, i32, i32) {
    %c0_i32 = arith.constant 0 : i32
    %c0_i32_0 = arith.constant 0 : i32
    %c0_i32_1 = arith.constant 0 : i32
    %c0_i32_2 = arith.constant 0 : i32
    return %arg0, %c0_i32, %c0_i32_0, %c0_i32_1 : i32, i32, i32, i32
  }
}

</mosaic_0001>

<bundles_post_ra>
// kernel: side_output_crop.1
= control target key start
LH: loop header
LB: loop body
LE: loop exit
PB: predicated region body
PF: predicated region fallthrough
CT: control target
= control target key end

     0   :  { %9 = vsyncpa [#allocation4], 0  ;;  %s481_s0 = inlined_call_operand.vmem [shape: f32[1,4,16,36], index: 0, kind: input, shape index: {}]   ;;  %s482_s1 = inlined_call_operand.vmem [shape: f32[4], index: 1, kind: input, shape index: {}]   ;;  %s483_s2 = inlined_call_operand.vmem [shape: f32[1,36], index: 2, kind: input, shape index: {}]   ;;  %s484_s3 = inlined_call_operand.vmem [shape: f32[16], index: 3, kind: input, shape index: {}]   ;;  %s485_s4 = inlined_call_operand.vmem [shape: f32[1,4,16,36], index: 4, kind: output, shape index: {}]  }
   0x1   :  { %s19_s17 = sshll.u32 %s482_s1, 4  ;;  %s20_s17 = int_to_ptr.vmem [resolvable:$true] %s19_s17 }
   0x2   :  { %10 = vsyncpa [#allocation6], 0  ;;  %s31_s20 = sshll.u32 %s484_s3, 4  ;;  %s297_s21 = scalar_lea.vmem %s20_s17, 16  ;;  %s32_s20 = int_to_ptr.vmem [resolvable:$true] %s31_s20 }
   0x3   :  { %p298_p0 = scmp.ne.s32.totalorder %s20_s17, %s297_s21  ;;  %p302_p1 = scmp.lt.s32.totalorder %s20_s17, %s20_s17 }
   0x4   :  { %p303_p2 = scmp.lt.s32.totalorder %s297_s21, %s297_s21 }
   0x6   :  { %p304_p3 = por %p303_p2, %p302_p1 }
   0x8   :  { %p305_p4 = pnand %p304_p3, %p298_p0 }
   0xa   :  { %308 = shalt.err (!%p305_p4)
}
   0xb   :  { %s325_s22 = smov [#allocation3]   ;;  %s309_s23 = scalar_lea.vmem %s32_s20, 16 }
   0xc   :  { %22 = dma.vmem_to_smem %s20_s17, 16, %s325_s22, [#allocation4]  }
   0xd   :  { %p310_p5 = scmp.ne.s32.totalorder %s32_s20, %s309_s23  ;;  %p314_p6 = scmp.lt.s32.totalorder %s32_s20, %s32_s20 }
   0xe   :  { %p315_p7 = scmp.lt.s32.totalorder %s309_s23, %s309_s23 }
  0x10   :  { %p316_p8 = por %p315_p7, %p314_p6 }
  0x12   :  { %p317_p9 = pnand %p316_p8, %p310_p5 }
  0x14   :  { %320 = shalt.err (!%p317_p9)
}
  0x15   :  { %s326_s1 = smov [#allocation5]  }
  0x16   :  { %34 = dma.vmem_to_smem %s32_s20, 16, %s326_s1, [#allocation6]  }
  0x17   :  { %321 = dma.done.wait [#allocation4], 16  }
  0x18   :  { %322 = vsyncadd [#allocation4], 4294967280 }
  0x19   :  { %323 = dma.done.wait [#allocation6], 16  }
  0x1a   :  { %324 = vsyncadd [#allocation6], 4294967280 }
  0x1b   :  { %41 = sfence }
  0x1c   :  { %vm42_vm0 = vcmask 303104   ;;  %vm45_vm1 = vcmask 310560   ;;  %v327_v0 = vmov 0.0   ;;  %s50_s3 = sld [smem:[#allocation3]]  ;;  %s264_s24 = sld [smem:[#allocation3 + $0x1]]  ;;  %v48_v1 = vld [vmem:[%s481_s0] sm:$0xff] }
  0x1d   :  { %43 = vst.msk [vmem:[#allocation2] sm:$0x1] %vm42_vm0, %v327_v0  ;;  %44 = vst.msk [vmem:[#allocation2 + $0x11] sm:$0x1] %vm42_vm0, %v327_v0  ;;  %s267_s25 = sld [smem:[#allocation3 + $0x2]]  ;;  %s270_s26 = sld [smem:[#allocation3 + $0x3]] }
  0x1e   :  { %46 = vst.msk [vmem:[#allocation2 + $0x1] sm:$0xff] %vm45_vm1, %v327_v0  ;;  %47 = vst.msk [vmem:[#allocation2 + $0x9] sm:$0xff] %vm45_vm1, %v327_v0  ;;  %v49_v2 = vld [vmem:[%s481_s0 + $0x8] sm:$0xff]  ;;  %v262_v3 = vld [vmem:[%s481_s0 + $0x10] sm:$0xff]  ;;  %s387_s19 = sld [smem:[#allocation5 + $0x9]]  ;;  %s393_s21 = sld [smem:[#allocation5 + $0x3]] }
  0x1f   :  { %v263_v4 = vld [vmem:[%s481_s0 + $0x18] sm:$0xff]  ;;  %v265_v5 = vld [vmem:[%s481_s0 + $0x20] sm:$0xff]  ;;  %v266_v6 = vld [vmem:[%s481_s0 + $0x28] sm:$0xff]  ;;  %s391_s20 = sld [smem:[#allocation5 + $0x1]]  ;;  %vm90_vm2 = vcmask 293888   ;;  %s395_s22 = sld [smem:[#allocation5 + $0xd]] }
  0x20   :  { %v268_v9 = vld [vmem:[%s481_s0 + $0x30] sm:$0xff]  ;;  %v269_v10 = vld [vmem:[%s481_s0 + $0x38] sm:$0xff]  ;;  %v271_v25 = vld [vmem:[%s483_s2] ss:$0 sm:$0xff]  ;;  %s389_s0 = sld [smem:[#allocation5 + $0xb]]  ;;  %s397_s23 = sld [smem:[#allocation5 + $0xf]] }
  0x21   :  { %s399_s2 = sld [smem:[#allocation5 + $0x5]]  ;;  %s401_s1 = sld [smem:[#allocation5 + $0x7]] }
  0x22   :  { %v51_v7 = vstv %s50_s3  ;;  %v58_v8 = vstv %s264_s24  ;;  %s403_s3 = sld [smem:[#allocation5 + $0x8]]  ;;  %s405_s24 = sld [smem:[#allocation5 + $0xa]] }
  0x23   :  { %v52_v11 = vmul.f32 %v51_v7, %v48_v1  ;;  %v53_v12 = vmul.f32 %v51_v7, %v49_v2  ;;  %v59_v13 = vmul.f32 %v262_v3, %v58_v8  ;;  %v60_v14 = vmul.f32 %v263_v4, %v58_v8  ;;  %s423_s27 = sld [smem:[#allocation5 + $0xc]]  ;;  %s425_s28 = sld [smem:[#allocation5 + $0xe]] }
  0x24   :  { %v65_v15 = vstv %s267_s25  ;;  %v74_v16 = vstv %s270_s26  ;;  %s409_s25 = sld [smem:[#allocation5]]  ;;  %s411_s26 = sld [smem:[#allocation5 + $0x2]]  ;;  %v146_v30 = vstv %s387_s19  ;;  %v230_v33 = vstv %s393_s21 }
  0x25   :  { %v66_v17 = vmul.f32 %v265_v5, %v65_v15  ;;  %v67_v18 = vmul.f32 %v266_v6, %v65_v15  ;;  %v75_v19 = vmul.f32 %v268_v9, %v74_v16  ;;  %v76_v20 = vmul.f32 %v269_v10, %v74_v16  ;;  %s427_s29 = sld [smem:[#allocation5 + $0x4]]  ;;  %s429_s30 = sld [smem:[#allocation5 + $0x6]] }
  0x26   :  { %v156_v31 = vstv %s389_s0  ;;  %v220_v32 = vstv %s391_s20  ;;  %v114_v34 = vstv %s395_s22  ;;  %v124_v35 = vstv %s397_s23  ;;  %s328_s5 = smov 127  }
  0x27   :  { %v68_v21 = vadd.f32 %v66_v17, %v52_v11  ;;  %v69_v22 = vadd.f32 %v67_v18, %v53_v12  ;;  %v77_v23 = vadd.f32 %v75_v19, %v59_v13  ;;  %v78_v24 = vadd.f32 %v76_v20, %v60_v14 }
  0x28   :  { %v187_v39 = vstv %s399_s2  ;;  %v197_v40 = vstv %s401_s1  ;;  %v143_v41 = vstv %s403_s3  ;;  %v151_v42 = vstv %s405_s24 }
  0x29   :  { %v79_v26 = vadd.f32 %v77_v23, %v68_v21  ;;  %v80_v27 = vadd.f32 %v78_v24, %v69_v22  ;;  %v111_v16 = vstv %s423_s27  ;;  %v119_v17 = vstv %s425_s28 }
  0x2a   :  { %v217_v60 = vstv %s409_s25  ;;  %v225_v61 = vstv %s411_s26 }
  0x2b   :  { %v88_v28 = vadd.f32 %v271_v25, %v79_v26  ;;  %v89_v29 = vadd.f32 %v271_v25, %v80_v27  ;;  %v184_v24 = vstv %s427_s29  ;;  %v192_v25 = vstv %s429_s30 }
  0x2d   :  { %91 = vst.msk [vmem:[#allocation2 + $0x1] sm:$0xff] %vm90_vm2, %v88_v28  ;;  %92 = vst.msk [vmem:[#allocation2 + $0x9] sm:$0xff] %vm90_vm2, %v89_v29 }
  0x34   :  { %v141_v36 = vld [vmem:[#allocation2] sm:$0xff]  ;;  %v142_v37 = vld [vmem:[#allocation2 + $0x8] sm:$0xff] }
  0x35   :  { %v149_v38 = vld [vmem:[#allocation2 + $0x1] sm:$0xff]  ;;  %v147_v43 = vmul.f32 %v146_v30, %v141_v36  ;;  %v148_v44 = vmul.f32 %v146_v30, %v142_v37  ;;  %v150_v45 = vld [vmem:[#allocation2 + $0x9] sm:$0xff]  ;;  %v115_v55 = vmul.f32 %v141_v36, %v114_v34  ;;  %v116_v57 = vmul.f32 %v142_v37, %v114_v34 }
  0x36   :  { %v157_v46 = vmul.f32 %v156_v31, %v149_v38  ;;  %v221_v47 = vmul.f32 %v220_v32, %v149_v38  ;;  %v223_v48 = vld [vmem:[#allocation2 + $0x2] sm:$0xff]  ;;  %v224_v49 = vld [vmem:[#allocation2 + $0xa] sm:$0xff]  ;;  %v158_v50 = vmul.f32 %v156_v31, %v150_v45  ;;  %v222_v51 = vmul.f32 %v220_v32, %v150_v45 }
  0x37   :  { %v231_v52 = vmul.f32 %v230_v33, %v223_v48  ;;  %v232_v53 = vmul.f32 %v230_v33, %v224_v49  ;;  %v125_v56 = vmul.f32 %v149_v38, %v124_v35  ;;  %v126_v59 = vmul.f32 %v150_v45, %v124_v35 }
  0x38   :  { %v159_v54 = vadd.f32 %v157_v46, %v147_v43  ;;  %v160_v62 = vadd.f32 %v158_v50, %v148_v44  ;;  %v152_v1 = vmul.f32 %v151_v42, %v149_v38  ;;  %v188_v3 = vmul.f32 %v187_v39, %v149_v38 }
  0x39   :  { %v233_v58 = vadd.f32 %v231_v52, %v221_v47  ;;  %v234_v63 = vadd.f32 %v232_v53, %v222_v51  ;;  %v127_v0 = vadd.f32 %v125_v56, %v115_v55  ;;  %v128_v2 = vadd.f32 %v126_v59, %v116_v57 }
  0x3a   :  { %163 = vrot.lane.b32.xlu0 %v159_v54, %s328_s5  ;;  %v198_v4 = vmul.f32 %v223_v48, %v197_v40  ;;  %v144_v5 = vmul.f32 %v143_v41, %v141_v36  ;;  %v189_v6 = vmul.f32 %v187_v39, %v150_v45  ;;  %v226_v7 = vmul.f32 %v225_v61, %v223_v48 }
  0x3b   :  { %237 = vrot.lane.b32.xlu1 %v233_v58, %s328_s5  ;;  %v218_v8 = vmul.f32 %v217_v60, %v149_v38  ;;  %v145_v9 = vmul.f32 %v143_v41, %v142_v37  ;;  %v199_v11 = vmul.f32 %v224_v49, %v197_v40  ;;  %v153_v12 = vmul.f32 %v151_v42, %v150_v45 }
  0x3c   :  { %v154_v10 = vadd.f32 %v152_v1, %v144_v5  ;;  %v219_v13 = vmul.f32 %v217_v60, %v150_v45  ;;  %v227_v15 = vmul.f32 %v225_v61, %v224_v49  ;;  %v120_v19 = vmul.f32 %v149_v38, %v119_v17 }
  0x3d   :  { %v228_v14 = vadd.f32 %v226_v7, %v218_v8  ;;  %v155_v18 = vadd.f32 %v153_v12, %v145_v9  ;;  %v112_v20 = vmul.f32 %v141_v36, %v111_v16  ;;  %v113_v21 = vmul.f32 %v142_v37, %v111_v16 }
  0x3e   :  { %165 = vrot.lane.b32.xlu0 %v160_v62, %s328_s5  ;;  %v229_v22 = vadd.f32 %v227_v15, %v219_v13  ;;  %v121_v23 = vmul.f32 %v150_v45, %v119_v17  ;;  %v185_v27 = vmul.f32 %v184_v24, %v149_v38  ;;  %v193_v28 = vmul.f32 %v223_v48, %v192_v25 }
  0x3f   :  { %239 = vrot.lane.b32.xlu1 %v234_v63, %s328_s5  ;;  %v122_v26 = vadd.f32 %v120_v19, %v112_v20  ;;  %v186_v29 = vmul.f32 %v184_v24, %v150_v45  ;;  %v200_v30 = vadd.f32 %v198_v4, %v188_v3  ;;  %v194_v32 = vmul.f32 %v224_v49, %v192_v25 }
  0x40   :  { %v123_v31 = vadd.f32 %v121_v23, %v113_v21  ;;  %v201_v33 = vadd.f32 %v199_v11, %v189_v6  ;;  %v195_v34 = vadd.f32 %v193_v28, %v185_v27 }
  0x41   :  { %v196_v35 = vadd.f32 %v194_v32, %v186_v29 }
  0x42   :  { %131 = vrot.lane.b32.xlu0 %v127_v0, %s328_s5 }
  0x43   :  { %133 = vrot.lane.b32.xlu1 %v128_v2, %s328_s5 }
  0x46   :  { %204 = vrot.lane.b32.xlu0 %v200_v30, %s328_s5 }
  0x47   :  { %206 = vrot.lane.b32.xlu1 %v201_v33, %s328_s5 }
  0xac   :  { %v164_v36 = vpop.permute.xlu0 %163 }
  0xad   :  { %v169_v37 = vadd.f32 %v164_v36, %v154_v10  ;;  %v238_v39 = vpop.permute.xlu1 %237 }
  0xae   :  { %v243_v38 = vadd.f32 %v238_v39, %v228_v14 }
  0xaf   :  { %173 = vrot.lane.b32.xlu0 %v169_v37, %s328_s5 }
  0xb0   :  { %v166_v40 = vpop.permute.xlu0 %165 }
  0xb1   :  { %v170_v41 = vadd.f32 %v166_v40, %v155_v18  ;;  %v240_v42 = vpop.permute.xlu1 %239 }
  0xb2   :  { %v244_v43 = vadd.f32 %v240_v42, %v229_v22 }
  0xb3   :  { %175 = vrot.lane.b32.xlu1 %v170_v41, %s328_s5  ;;  %247 = vrot.lane.b32.xlu0 %v243_v38, %s328_s5 }
  0xb4   :  { %v132_v44 = vpop.permute.xlu0 %131 }
  0xb5   :  { %v137_v45 = vadd.f32 %v132_v44, %v122_v26  ;;  %v134_v46 = vpop.permute.xlu1 %133 }
  0xb6   :  { %v138_v47 = vadd.f32 %v134_v46, %v123_v31 }
  0xb7   :  { %249 = vrot.lane.b32.xlu1 %v244_v43, %s328_s5  ;;  %139 = vst.msk [vmem:[%s485_s4] sm:$0xff] %vm90_vm2, %v137_v45 }
  0xb8   :  { %140 = vst.msk [vmem:[%s485_s4 + $0x8] sm:$0xff] %vm90_vm2, %v138_v47  ;;  %v205_v48 = vpop.permute.xlu0 %204 }
  0xb9   :  { %v210_v49 = vadd.f32 %v205_v48, %v195_v34  ;;  %v207_v50 = vpop.permute.xlu1 %206 }
  0xba   :  { %v211_v51 = vadd.f32 %v207_v50, %v196_v35 }
  0xbb   :  { %289 = vst.msk [vmem:[%s485_s4 + $0x20] sm:$0xff] %vm90_vm2, %v210_v49 }
  0xbc   :  { %290 = vst.msk [vmem:[%s485_s4 + $0x28] sm:$0xff] %vm90_vm2, %v211_v51 }
 0x121   :  { %v174_v52 = vpop.permute.xlu0 %173 }
 0x122   :  { %287 = vst.msk [vmem:[%s485_s4 + $0x10] sm:$0xff] %vm90_vm2, %v174_v52 }
 0x125   :  { %v176_v53 = vpop.permute.xlu1 %175  ;;  %v248_v54 = vpop.permute.xlu0 %247 }
 0x126   :  { %288 = vst.msk [vmem:[%s485_s4 + $0x18] sm:$0xff] %vm90_vm2, %v176_v53  ;;  %291 = vst.msk [vmem:[%s485_s4 + $0x30] sm:$0xff] %vm90_vm2, %v248_v54 }
 0x129   :  { %v250_v55 = vpop.permute.xlu1 %249 }
 0x12a   :  { %292 = vst.msk [vmem:[%s485_s4 + $0x38] sm:$0xff] %vm90_vm2, %v250_v55 }
 0x12b   :  { %260 = vsyncpa [#allocation4], 1 }
 0x12c   :  { %261 = vsyncpa [#allocation6], 1 }

</bundles_post_ra>
